<compile_context>
chip_gen: v6e
topology: v6e:2x2x1
jax: 0.10.0
libtpu: 0.0.40
codegen_flags: <defaults>
</compile_context>

<pallas_src>
import functools

import jax
import jax.numpy as jnp
from jax.experimental import pallas as pl
from jax.experimental.pallas import tpu as pltpu

LANE = 128
SUBLANE = 8


def _round_up(x, m):
    return (x + m - 1) // m * m


# ----------------------------------------------------------------------------
# Fused kernel: 4 x (matmul + bias + ReLU), all intermediates stay in VMEM.
# Weights arrive pre-transposed (K, N) in bf16; accumulation is f32 on the MXU.
# ----------------------------------------------------------------------------
def _mlp_fused_kernel(x_ref, w1_ref, b1_ref, w2_ref, b2_ref,
                      w3_ref, b3_ref, w4_ref, b4_ref, o_ref):
    h = jnp.dot(x_ref[...], w1_ref[...], preferred_element_type=jnp.float32)
    h = jnp.maximum(h + b1_ref[...], 0.0)

    h = jnp.dot(h.astype(w2_ref.dtype), w2_ref[...],
                preferred_element_type=jnp.float32)
    h = jnp.maximum(h + b2_ref[...], 0.0)

    h = jnp.dot(h.astype(w3_ref.dtype), w3_ref[...],
                preferred_element_type=jnp.float32)
    h = jnp.maximum(h + b3_ref[...], 0.0)

    h = jnp.dot(h.astype(w4_ref.dtype), w4_ref[...],
                preferred_element_type=jnp.float32)
    h = jnp.maximum(h + b4_ref[...], 0.0)   # PyTorch forward applies ReLU to fc4 too

    o_ref[...] = h.astype(o_ref.dtype)


# ----------------------------------------------------------------------------
# One-time parameter preparation (NOT in the hot path):
#   torch layout (N, K) -> (K, N), cast weights to bf16, pad fc4 out-dim to 128.
# ----------------------------------------------------------------------------
def prepare_params(torch_params, *, weight_dtype=jnp.bfloat16):
    w1, b1, w2, b2, w3, b3, w4, b4 = torch_params
    n_out = w4.shape[0]
    n_pad = _round_up(max(n_out, LANE), LANE)

    w4_t = w4.T.astype(weight_dtype)                      # (H, n_out)
    w4_p = jnp.zeros((w4_t.shape[0], n_pad), weight_dtype).at[:, :n_out].set(w4_t)
    b4_p = jnp.zeros((n_pad,), jnp.float32).at[:n_out].set(b4.astype(jnp.float32))

    arrays = (
        w1.T.astype(weight_dtype), b1.reshape(1, -1).astype(jnp.float32),
        w2.T.astype(weight_dtype), b2.reshape(1, -1).astype(jnp.float32),
        w3.T.astype(weight_dtype), b3.reshape(1, -1).astype(jnp.float32),
        w4_p,                      b4_p.reshape(1, -1),
    )
    return arrays, n_out


# ----------------------------------------------------------------------------
# Forward pass (hot path): flatten + one fused pallas_call.
# ----------------------------------------------------------------------------
def mlp_forward(x, prepped_arrays, n_out, *, tm=128):
    w1, b1, w2, b2, w3, b3, w4, b4 = prepped_arrays

    B = x.shape[0]
    xf = x.reshape(B, -1).astype(w1.dtype)                # Flatten (x.view(B, -1))
    K = xf.shape[1]
    H1, H2, H3, Np = w1.shape[1], w2.shape[1], w3.shape[1], w4.shape[1]

    # Pad batch rows to a sublane-aligned row tile.
    tm = min(tm, _round_up(B, SUBLANE))
    Bp = _round_up(B, tm)
    if Bp != B:
        xf = jnp.pad(xf, ((0, Bp - B), (0, 0)))
    grid = (Bp // tm,)

    flops = 2 * Bp * (K * H1 + H1 * H2 + H2 * H3 + H3 * Np)
    bytes_accessed = int(
        xf.size * xf.dtype.itemsize
        + sum(a.size * a.dtype.itemsize for a in (w1, b1, w2, b2, w3, b3, w4, b4))
        + Bp * Np * 4)
    cost = pl.CostEstimate(flops=flops, transcendentals=0,
                           bytes_accessed=bytes_accessed)

    full = lambda i: (0, 0)   # weights/biases: same block for every grid step
    out_padded = pl.pallas_call(
        _mlp_fused_kernel,
        out_shape=jax.ShapeDtypeStruct((Bp, Np), jnp.float32),
        grid=grid,
        in_specs=[
            pl.BlockSpec((tm, K), lambda i: (i, 0)),
            pl.BlockSpec((K, H1), full), pl.BlockSpec((1, H1), full),
            pl.BlockSpec((H1, H2), full), pl.BlockSpec((1, H2), full),
            pl.BlockSpec((H2, H3), full), pl.BlockSpec((1, H3), full),
            pl.BlockSpec((H3, Np), full), pl.BlockSpec((1, Np), full),
        ],
        out_specs=pl.BlockSpec((tm, Np), lambda i: (i, 0)),
        compiler_params=pltpu.CompilerParams(
            dimension_semantics=("parallel",),
            vmem_limit_bytes=48 << 20),
        cost_estimate=cost,
    )(xf, w1, b1, w2, b2, w3, b3, w4, b4)

    return out_padded[:B, :n_out]


# ----------------------------------------------------------------------------
# Pure-JAX f32 reference (PyTorch semantics) + PyTorch-style init.
# ----------------------------------------------------------------------------
def mlp_reference(x, torch_params):
    w1, b1, w2, b2, w3, b3, w4, b4 = torch_params
    h = x.reshape(x.shape[0], -1)
    h = jnp.maximum(h @ w1.T + b1, 0.0)
    h = jnp.maximum(h @ w2.T + b2, 0.0)
    h = jnp.maximum(h @ w3.T + b3, 0.0)
    h = jnp.maximum(h @ w4.T + b4, 0.0)
    return h


def init_torch_params(key, hidden_size, in_dim=784, n_classes=10):
    ks = jax.random.split(key, 8)

    def lin(kw, kb, n_out, n_in):
        bound = 1.0 / (n_in ** 0.5)
        w = jax.random.uniform(kw, (n_out, n_in), jnp.float32, -bound, bound)
        b = jax.random.uniform(kb, (n_out,), jnp.float32, -bound, bound)
        return w, b

    w1, b1 = lin(ks[0], ks[1], hidden_size, in_dim)
    w2, b2 = lin(ks[2], ks[3], hidden_size, hidden_size)
    w3, b3 = lin(ks[4], ks[5], hidden_size, hidden_size)
    w4, b4 = lin(ks[6], ks[7], n_classes, hidden_size)
    return (w1, b1, w2, b2, w3, b3, w4, b4)


if __name__ == "__main__":
    BATCH, HIDDEN, NCLASS = 2, 256, 10      # module default hidden=400 also works

    key = jax.random.PRNGKey(0)
    kx, kp = jax.random.split(key)
    x = jax.random.normal(kx, (BATCH, 1, 28, 28), jnp.float32)
    torch_params = init_torch_params(kp, HIDDEN, 28 * 28, NCLASS)

    # One-time prep (weight transpose / bf16 cast / class-dim padding).
    prepped_arrays, n_out = prepare_params(torch_params)

    fwd = jax.jit(functools.partial(mlp_forward, n_out=n_out))
    out = jax.block_until_ready(fwd(x, prepped_arrays))
    ref = jax.block_until_ready(mlp_reference(x, torch_params))

    assert out.shape == (BATCH, NCLASS)
    # bf16 weight streaming with f32 accumulation -> small relative error vs f32 ref.
    assert jnp.allclose(out, ref, rtol=2e-2, atol=2e-2), "mismatch vs reference"
    print("KERNEL_OK")
</pallas_src>

<mosaic_0001>
module attributes {stable_mosaic.version = 11 : i64} {
  func.func @_mlp_fused_kernel(%arg0: i32, %arg1: memref<8x784xbf16, #tpu.memory_space<vmem>>, %arg2: memref<784x256xbf16, #tpu.memory_space<vmem>>, %arg3: memref<1x256xf32, #tpu.memory_space<vmem>>, %arg4: memref<256x256xbf16, #tpu.memory_space<vmem>>, %arg5: memref<1x256xf32, #tpu.memory_space<vmem>>, %arg6: memref<256x256xbf16, #tpu.memory_space<vmem>>, %arg7: memref<1x256xf32, #tpu.memory_space<vmem>>, %arg8: memref<256x128xbf16, #tpu.memory_space<vmem>>, %arg9: memref<1x128xf32, #tpu.memory_space<vmem>>, %arg10: memref<8x128xf32, #tpu.memory_space<vmem>>) attributes {dimension_semantics = [#tpu.dimension_semantics<parallel>], iteration_bounds = array<i64: 1>, scalar_prefetch = 0 : i64, scratch_operands = 0 : i64, tpu.core_type = #tpu.core_type<tc>, window_params = [{transform_indices = @transform_0, window_bounds = array<i64: 8, 784>}, {pipeline_mode = #tpu.pipeline_mode<synchronous>, transform_indices = @transform_1, window_bounds = array<i64: 784, 256>}, {pipeline_mode = #tpu.pipeline_mode<synchronous>, transform_indices = @transform_2, window_bounds = array<i64: 1, 256>}, {pipeline_mode = #tpu.pipeline_mode<synchronous>, transform_indices = @transform_3, window_bounds = array<i64: 256, 256>}, {pipeline_mode = #tpu.pipeline_mode<synchronous>, transform_indices = @transform_4, window_bounds = array<i64: 1, 256>}, {pipeline_mode = #tpu.pipeline_mode<synchronous>, transform_indices = @transform_5, window_bounds = array<i64: 256, 256>}, {pipeline_mode = #tpu.pipeline_mode<synchronous>, transform_indices = @transform_6, window_bounds = array<i64: 1, 256>}, {pipeline_mode = #tpu.pipeline_mode<synchronous>, transform_indices = @transform_7, window_bounds = array<i64: 256, 128>}, {pipeline_mode = #tpu.pipeline_mode<synchronous>, transform_indices = @transform_8, window_bounds = array<i64: 1, 128>}, {transform_indices = @transform_9, window_bounds = array<i64: 8, 128>}]} {
    %c0 = arith.constant 0 : index
    %c0_0 = arith.constant 0 : index
    %0 = vector.load %arg1[%c0, %c0_0] : memref<8x784xbf16, #tpu.memory_space<vmem>>, vector<8x784xbf16>
    %c0_1 = arith.constant 0 : index
    %c0_2 = arith.constant 0 : index
    %1 = vector.load %arg2[%c0_1, %c0_2] : memref<784x256xbf16, #tpu.memory_space<vmem>>, vector<784x256xbf16>
    %cst = arith.constant dense<0.000000e+00> : vector<8x256xf32>
    %2 = tpu.matmul %0, %1, %cst {dimension_numbers = #tpu.dot_dimension_numbers<[1], [0], [0], [1], [0, 0, 1, 1], [], []>} : vector<8x784xbf16>, vector<784x256xbf16>, vector<8x256xf32> -> vector<8x256xf32>
    %c0_3 = arith.constant 0 : index
    %c0_4 = arith.constant 0 : index
    %3 = vector.load %arg3[%c0_3, %c0_4] : memref<1x256xf32, #tpu.memory_space<vmem>>, vector<1x256xf32>
    %4 = vector.broadcast %3 : vector<1x256xf32> to vector<8x256xf32>
    %5 = arith.addf %2, %4 : vector<8x256xf32>
    %cst_5 = arith.constant 0.000000e+00 : f32
    %6 = vector.broadcast %cst_5 : f32 to vector<8x256xf32>
    %7 = arith.maximumf %5, %6 : vector<8x256xf32>
    %8 = arith.truncf %7 : vector<8x256xf32> to vector<8x256xbf16>
    %c0_6 = arith.constant 0 : index
    %c0_7 = arith.constant 0 : index
    %9 = vector.load %arg4[%c0_6, %c0_7] : memref<256x256xbf16, #tpu.memory_space<vmem>>, vector<256x256xbf16>
    %cst_8 = arith.constant dense<0.000000e+00> : vector<8x256xf32>
    %10 = tpu.matmul %8, %9, %cst_8 {dimension_numbers = #tpu.dot_dimension_numbers<[1], [0], [0], [1], [0, 0, 1, 1], [], []>} : vector<8x256xbf16>, vector<256x256xbf16>, vector<8x256xf32> -> vector<8x256xf32>
    %c0_9 = arith.constant 0 : index
    %c0_10 = arith.constant 0 : index
    %11 = vector.load %arg5[%c0_9, %c0_10] : memref<1x256xf32, #tpu.memory_space<vmem>>, vector<1x256xf32>
    %12 = vector.broadcast %11 : vector<1x256xf32> to vector<8x256xf32>
    %13 = arith.addf %10, %12 : vector<8x256xf32>
    %cst_11 = arith.constant 0.000000e+00 : f32
    %14 = vector.broadcast %cst_11 : f32 to vector<8x256xf32>
    %15 = arith.maximumf %13, %14 : vector<8x256xf32>
    %16 = arith.truncf %15 : vector<8x256xf32> to vector<8x256xbf16>
    %c0_12 = arith.constant 0 : index
    %c0_13 = arith.constant 0 : index
    %17 = vector.load %arg6[%c0_12, %c0_13] : memref<256x256xbf16, #tpu.memory_space<vmem>>, vector<256x256xbf16>
    %cst_14 = arith.constant dense<0.000000e+00> : vector<8x256xf32>
    %18 = tpu.matmul %16, %17, %cst_14 {dimension_numbers = #tpu.dot_dimension_numbers<[1], [0], [0], [1], [0, 0, 1, 1], [], []>} : vector<8x256xbf16>, vector<256x256xbf16>, vector<8x256xf32> -> vector<8x256xf32>
    %c0_15 = arith.constant 0 : index
    %c0_16 = arith.constant 0 : index
    %19 = vector.load %arg7[%c0_15, %c0_16] : memref<1x256xf32, #tpu.memory_space<vmem>>, vector<1x256xf32>
    %20 = vector.broadcast %19 : vector<1x256xf32> to vector<8x256xf32>
    %21 = arith.addf %18, %20 : vector<8x256xf32>
    %cst_17 = arith.constant 0.000000e+00 : f32
    %22 = vector.broadcast %cst_17 : f32 to vector<8x256xf32>
    %23 = arith.maximumf %21, %22 : vector<8x256xf32>
    %24 = arith.truncf %23 : vector<8x256xf32> to vector<8x256xbf16>
    %c0_18 = arith.constant 0 : index
    %c0_19 = arith.constant 0 : index
    %25 = vector.load %arg8[%c0_18, %c0_19] : memref<256x128xbf16, #tpu.memory_space<vmem>>, vector<256x128xbf16>
    %cst_20 = arith.constant dense<0.000000e+00> : vector<8x128xf32>
    %26 = tpu.matmul %24, %25, %cst_20 {dimension_numbers = #tpu.dot_dimension_numbers<[1], [0], [0], [1], [0, 0, 1, 1], [], []>} : vector<8x256xbf16>, vector<256x128xbf16>, vector<8x128xf32> -> vector<8x128xf32>
    %c0_21 = arith.constant 0 : index
    %c0_22 = arith.constant 0 : index
    %27 = vector.load %arg9[%c0_21, %c0_22] : memref<1x128xf32, #tpu.memory_space<vmem>>, vector<1x128xf32>
    %28 = vector.broadcast %27 : vector<1x128xf32> to vector<8x128xf32>
    %29 = arith.addf %26, %28 : vector<8x128xf32>
    %cst_23 = arith.constant 0.000000e+00 : f32
    %30 = vector.broadcast %cst_23 : f32 to vector<8x128xf32>
    %31 = arith.maximumf %29, %30 : vector<8x128xf32>
    %c0_24 = arith.constant 0 : index
    %c0_25 = arith.constant 0 : index
    %32 = vector.load %arg10[%c0_24, %c0_25] : memref<8x128xf32, #tpu.memory_space<vmem>>, vector<8x128xf32>
    tpu.vector_store %arg10[%c0_24, %c0_25], %31 {strides = array<i32>} : memref<8x128xf32, #tpu.memory_space<vmem>>, vector<8x128xf32>,
    return
  }
  func.func @transform_0(%arg0: i32) -> (i32, i32) {
    %c0_i32 = arith.constant 0 : i32
    %c0_i32_0 = arith.constant 0 : i32
    return %arg0, %c0_i32 : i32, i32
  }
  func.func @transform_1(%arg0: i32) -> (i32, i32) {
    %c0_i32 = arith.constant 0 : i32
    %c0_i32_0 = arith.constant 0 : i32
    %c0_i32_1 = arith.constant 0 : i32
    return %c0_i32, %c0_i32_0 : i32, i32
  }
  func.func @transform_2(%arg0: i32) -> (i32, i32) {
    %c0_i32 = arith.constant 0 : i32
    %c0_i32_0 = arith.constant 0 : i32
    %c0_i32_1 = arith.constant 0 : i32
    return %c0_i32, %c0_i32_0 : i32, i32
  }
  func.func @transform_3(%arg0: i32) -> (i32, i32) {
    %c0_i32 = arith.constant 0 : i32
    %c0_i32_0 = arith.constant 0 : i32
    %c0_i32_1 = arith.constant 0 : i32
    return %c0_i32, %c0_i32_0 : i32, i32
  }
  func.func @transform_4(%arg0: i32) -> (i32, i32) {
    %c0_i32 = arith.constant 0 : i32
    %c0_i32_0 = arith.constant 0 : i32
    %c0_i32_1 = arith.constant 0 : i32
    return %c0_i32, %c0_i32_0 : i32, i32
  }
  func.func @transform_5(%arg0: i32) -> (i32, i32) {
    %c0_i32 = arith.constant 0 : i32
    %c0_i32_0 = arith.constant 0 : i32
    %c0_i32_1 = arith.constant 0 : i32
    return %c0_i32, %c0_i32_0 : i32, i32
  }
  func.func @transform_6(%arg0: i32) -> (i32, i32) {
    %c0_i32 = arith.constant 0 : i32
    %c0_i32_0 = arith.constant 0 : i32
    %c0_i32_1 = arith.constant 0 : i32
    return %c0_i32, %c0_i32_0 : i32, i32
  }
  func.func @transform_7(%arg0: i32) -> (i32, i32) {
    %c0_i32 = arith.constant 0 : i32
    %c0_i32_0 = arith.constant 0 : i32
    %c0_i32_1 = arith.constant 0 : i32
    return %c0_i32, %c0_i32_0 : i32, i32
  }
  func.func @transform_8(%arg0: i32) -> (i32, i32) {
    %c0_i32 = arith.constant 0 : i32
    %c0_i32_0 = arith.constant 0 : i32
    %c0_i32_1 = arith.constant 0 : i32
    return %c0_i32, %c0_i32_0 : i32, i32
  }
  func.func @transform_9(%arg0: i32) -> (i32, i32) {
    %c0_i32 = arith.constant 0 : i32
    %c0_i32_0 = arith.constant 0 : i32
    return %arg0, %c0_i32 : i32, i32
  }
}

</mosaic_0001>

<bundles_post_ra>
// kernel: mlp_forward.1
= control target key start
LH: loop header
LB: loop body
LE: loop exit
PB: predicated region body
PF: predicated region fallthrough
CT: control target
= control target key end

     0   :  { %14 = vsyncpa [#allocation3], 0  ;;  %s2256_s0 = inlined_call_operand.vmem [shape: bf16[8,784], index: 0, kind: input, shape index: {}]   ;;  %s2257_s1 = inlined_call_operand.hbm [shape: bf16[784,256], index: 1, kind: input, shape index: {}]   ;;  %s2258_s2 = inlined_call_operand.vmem [shape: f32[1,256], index: 2, kind: input, shape index: {}]   ;;  %s2259_s3 = inlined_call_operand.hbm [shape: bf16[256,256], index: 3, kind: input, shape index: {}]   ;;  %s2260_s4 = inlined_call_operand.vmem [shape: f32[1,256], index: 4, kind: input, shape index: {}]   ;;  %s2261_s5 = inlined_call_operand.hbm [shape: bf16[256,256], index: 5, kind: input, shape index: {}]   ;;  %s2262_s6 = inlined_call_operand.vmem [shape: f32[1,256], index: 6, kind: input, shape index: {}]   ;;  %s2263_s7 = inlined_call_operand.vmem [shape: bf16[256,128], index: 7, kind: input, shape index: {}]   ;;  %s2264_s8 = inlined_call_operand.vmem [shape: f32[1,128], index: 8, kind: input, shape index: {}]   ;;  %s2265_s9 = inlined_call_operand.vmem [shape: f32[8,128], index: 9, kind: output, shape index: {}]  }
   0x1   :  { %15 = vsyncpa [#allocation5], 0  ;;  %s2100_s30 = smov [#allocation4]   ;;  %s2101_s11 = smov [#allocation2]  }
   0x2   :  { %s37_s10 = sshll.u32 %s2100_s30, 4  ;;  %s23_s12 = sshll.u32 %s2101_s11, 4  ;;  %s38_s10 = int_to_ptr.vmem [resolvable:$true] %s37_s10  ;;  %s24_s12 = int_to_ptr.vmem [resolvable:$true] %s23_s12 }
   0x3   :  { %s2044_s13 = scalar_lea.vmem %s38_s10, 4096  ;;  %p2049_p1 = scmp.lt.s32.totalorder %s38_s10, %s38_s10 }
   0x4   :  { %p2045_p0 = scmp.ne.s32.totalorder %s38_s10, %s2044_s13  ;;  %p2050_p2 = scmp.lt.s32.totalorder %s2044_s13, %s2044_s13 }
   0x6   :  { %p2051_p3 = por %p2050_p2, %p2049_p1 }
   0x8   :  { %p2052_p4 = pnand %p2051_p3, %p2045_p0 }
   0xa   :  { %2055 = shalt.err (!%p2052_p4)
}
   0xb   :  { %s2102_s14 = smov 128   ;;  %s2103_s15 = smov 8  }
   0xc   :  { %43 = dma.hbm_to_vmem [thread:$0]  %s2259_s3, 4096, %s38_s10, [#allocation5], %s2102_s14, %s2102_s14, %s2103_s15  }
   0xd   :  { %s2064_s18 = scalar_lea.vmem %s24_s12, 12544  ;;  %p2069_p6 = scmp.lt.s32.totalorder %s24_s12, %s24_s12 }
   0xe   :  { %p2065_p5 = scmp.ne.s32.totalorder %s24_s12, %s2064_s18  ;;  %p2070_p7 = scmp.lt.s32.totalorder %s2064_s18, %s2064_s18 }
  0x10   :  { %p2071_p8 = por %p2070_p7, %p2069_p6 }
  0x12   :  { %p2072_p9 = pnand %p2071_p8, %p2065_p5 }
  0x14   :  { %2075 = shalt.err (!%p2072_p9)
}
  0x15   :  { %29 = dma.hbm_to_vmem [thread:$0]  %s2257_s1, 12544, %s24_s12, [#allocation3], %s2102_s14, %s2102_s14, %s2103_s15  }
  0x16   :  { %s2104_s21 = smov [#allocation6]  }
  0x17   :  { %s51_s22 = sshll.u32 %s2104_s21, 4  ;;  %s52_s22 = int_to_ptr.vmem [resolvable:$true] %s51_s22 }
  0x18   :  { %s2084_s23 = scalar_lea.vmem %s52_s22, 4096  ;;  %p2089_p11 = scmp.lt.s32.totalorder %s52_s22, %s52_s22 }
  0x19   :  { %p2085_p10 = scmp.ne.s32.totalorder %s52_s22, %s2084_s23  ;;  %p2090_p12 = scmp.lt.s32.totalorder %s2084_s23, %s2084_s23 }
  0x1b   :  { %p2091_p13 = por %p2090_p12, %p2089_p11 }
  0x1d   :  { %p2092_p0 = pnand %p2091_p13, %p2085_p10 }
  0x1f   :  { %2095 = shalt.err (!%p2092_p0)
}
  0x20   :  { %57 = dma.hbm_to_vmem [thread:$0]  %s2261_s5, 4096, %s52_s22, [#allocation5], %s2102_s14, %s2102_s14, %s2103_s15  }
  0x21   :  { %2096 = dma.done.wait [#allocation3], 12544  }
  0x22   :  { %2097 = vsyncadd [#allocation3], 4294954752 }
  0x23   :  { %2098 = dma.done.wait [#allocation5], 8192  }
  0x24   :  { %2099 = vsyncadd [#allocation5], 4294959104  ;;  %v1770_v0 = vld [vmem:[#allocation2 + $0x74] ss:$8 sps:$4 sm:$0xff]   ;;  %v1772_v1 = vld [vmem:[#allocation2 + $0x70] ss:$8 sps:$4 sm:$0xff]  }
  0x25   :  { %706 = vmatprep.subr.bf16.mxu0 %v1770_v0  ;;  %v1773_v2 = vld [vmem:[#allocation2 + $0x174] ss:$8 sps:$4 sm:$0xff]   ;;  %v1775_v3 = vld [vmem:[#allocation2 + $0x170] ss:$8 sps:$4 sm:$0xff]   ;;  %v1776_v4 = vld [vmem:[#allocation2 + $0x64] ss:$8 sps:$4 sm:$0xff]  }
  0x26   :  { %707 = vmatpush1.bf16.msra.mxu0 %v1772_v1  ;;  %v1778_v5 = vld [vmem:[#allocation2 + $0x60] ss:$8 sps:$4 sm:$0xff]   ;;  %747 = vmatprep.subr.bf16.mxu1 %v1773_v2  ;;  %v1779_v6 = vld [vmem:[#allocation2 + $0x164] ss:$8 sps:$4 sm:$0xff]   ;;  %v1782_v8 = vld [vmem:[#allocation2 + $0x54] ss:$8 sps:$4 sm:$0xff]  }
  0x27   :  { %748 = vmatpush1.bf16.msra.mxu1 %v1775_v3  ;;  %708 = vmatprep.subr.bf16.mxu0 %v1776_v4  ;;  %v1781_v7 = vld [vmem:[#allocation2 + $0x160] ss:$8 sps:$4 sm:$0xff]   ;;  %v1784_v9 = vld [vmem:[#allocation2 + $0x50] ss:$8 sps:$4 sm:$0xff]   ;;  %v1785_v10 = vld [vmem:[#allocation2 + $0x154] ss:$8 sps:$4 sm:$0xff]  }
  0x28   :  { %749 = vmatprep.subr.bf16.mxu1 %v1779_v6  ;;  %v1788_v11 = vld [vmem:[#allocation2 + $0x44] ss:$8 sps:$4 sm:$0xff]   ;;  %v1787_v12 = vld [vmem:[#allocation2 + $0x150] ss:$8 sps:$4 sm:$0xff]   ;;  %v1790_v14 = vld [vmem:[#allocation2 + $0x40] ss:$8 sps:$4 sm:$0xff]  }
  0x29   :  { %v1791_v13 = vld [vmem:[#allocation2 + $0x144] ss:$8 sps:$4 sm:$0xff]   ;;  %v1794_v15 = vld [vmem:[#allocation2 + $0x34] ss:$8 sps:$4 sm:$0xff]   ;;  %v1793_v16 = vld [vmem:[#allocation2 + $0x140] ss:$8 sps:$4 sm:$0xff]  }
  0x2a   :  { %709 = vmatpush1.bf16.msra.mxu0 %v1778_v5  ;;  %v1797_v17 = vld [vmem:[#allocation2 + $0x134] ss:$8 sps:$4 sm:$0xff]   ;;  %v1796_v18 = vld [vmem:[#allocation2 + $0x30] ss:$8 sps:$4 sm:$0xff]   ;;  %v1800_v19 = vld [vmem:[#allocation2 + $0x24] ss:$8 sps:$4 sm:$0xff]  }
  0x2b   :  { %710 = vmatprep.subr.bf16.mxu0 %v1782_v8  ;;  %750 = vmatpush1.bf16.msra.mxu1 %v1781_v7  ;;  %v1799_v20 = vld [vmem:[#allocation2 + $0x130] ss:$8 sps:$4 sm:$0xff]   ;;  %v1803_v21 = vld [vmem:[#allocation2 + $0x124] ss:$8 sps:$4 sm:$0xff]   ;;  %v1802_v22 = vld [vmem:[#allocation2 + $0x20] ss:$8 sps:$4 sm:$0xff]  }
  0x2c   :  { %751 = vmatprep.subr.bf16.mxu1 %v1785_v10  ;;  %v1806_v23 = vld [vmem:[#allocation2 + $0x14] ss:$8 sps:$4 sm:$0xff]   ;;  %v1805_v24 = vld [vmem:[#allocation2 + $0x120] ss:$8 sps:$4 sm:$0xff]   ;;  %v1808_v26 = vld [vmem:[#allocation2 + $0x10] ss:$8 sps:$4 sm:$0xff]  }
  0x2d   :  { %v1809_v25 = vld [vmem:[#allocation2 + $0x114] ss:$8 sps:$4 sm:$0xff]   ;;  %v1812_v27 = vld [vmem:[#allocation2 + $0x4] ss:$8 sps:$4 sm:$0xff]   ;;  %v1811_v28 = vld [vmem:[#allocation2 + $0x110] ss:$8 sps:$4 sm:$0xff]  }
  0x2e   :  { %711 = vmatpush1.bf16.msra.mxu0 %v1784_v9  ;;  %v1815_v29 = vld [vmem:[#allocation2 + $0x104] ss:$8 sps:$4 sm:$0xff]   ;;  %v1814_v30 = vld [vmem:[#allocation2] ss:$8 sps:$4 sm:$0xff]   ;;  %v1818_v31 = vld [vmem:[#allocation2 + $0xf4] ss:$8 sps:$4 sm:$0xff]  }
  0x2f   :  { %712 = vmatprep.subr.bf16.mxu0 %v1788_v11  ;;  %752 = vmatpush1.bf16.msra.mxu1 %v1787_v12  ;;  %v1817_v32 = vld [vmem:[#allocation2 + $0x100] ss:$8 sps:$4 sm:$0xff]   ;;  %v1821_v33 = vld [vmem:[#allocation2 + $0x1f4] ss:$8 sps:$4 sm:$0xff]   ;;  %v1820_v34 = vld [vmem:[#allocation2 + $0xf0] ss:$8 sps:$4 sm:$0xff]  }
  0x30   :  { %753 = vmatprep.subr.bf16.mxu1 %v1791_v13  ;;  %v1824_v35 = vld [vmem:[#allocation2 + $0xe4] ss:$8 sps:$4 sm:$0xff]   ;;  %v1823_v36 = vld [vmem:[#allocation2 + $0x1f0] ss:$8 sps:$4 sm:$0xff]   ;;  %v1826_v38 = vld [vmem:[#allocation2 + $0xe0] ss:$8 sps:$4 sm:$0xff]  }
  0x31   :  { %v1827_v37 = vld [vmem:[#allocation2 + $0x1e4] ss:$8 sps:$4 sm:$0xff]   ;;  %v1830_v39 = vld [vmem:[#allocation2 + $0xd4] ss:$8 sps:$4 sm:$0xff]   ;;  %v1829_v40 = vld [vmem:[#allocation2 + $0x1e0] ss:$8 sps:$4 sm:$0xff]  }
  0x32   :  { %713 = vmatpush1.bf16.msra.mxu0 %v1790_v14  ;;  %v1833_v41 = vld [vmem:[#allocation2 + $0x1d4] ss:$8 sps:$4 sm:$0xff]   ;;  %v1832_v42 = vld [vmem:[#allocation2 + $0xd0] ss:$8 sps:$4 sm:$0xff]   ;;  %v1836_v43 = vld [vmem:[#allocation2 + $0xc4] ss:$8 sps:$4 sm:$0xff]  }
  0x33   :  { %714 = vmatprep.subr.bf16.mxu0 %v1794_v15  ;;  %754 = vmatpush1.bf16.msra.mxu1 %v1793_v16  ;;  %v1835_v44 = vld [vmem:[#allocation2 + $0x1d0] ss:$8 sps:$4 sm:$0xff]   ;;  %v1839_v45 = vld [vmem:[#allocation2 + $0x1c4] ss:$8 sps:$4 sm:$0xff]   ;;  %v1838_v47 = vld [vmem:[#allocation2 + $0xc0] ss:$8 sps:$4 sm:$0xff]  }
  0x34   :  { %755 = vmatprep.subr.bf16.mxu1 %v1797_v17  ;;  %v74_v46 = vld [vmem:[%s2256_s0] sm:$0xff]  ;;  %v1842_v49 = vld [vmem:[#allocation2 + $0xb4] ss:$8 sps:$4 sm:$0xff]   ;;  %v75_v50 = vld [vmem:[%s2256_s0 + $0x8] sm:$0xff]  ;;  %v2105_v16 = vmov 0   ;;  %vm702_vm0 = vcmask 130048  }
  0x35   :  { %v1556_v48 = vcombine.high %v74_v46, %v74_v46  ;;  %v1841_v51 = vld [vmem:[#allocation2 + $0x1c0] ss:$8 sps:$4 sm:$0xff]   ;;  %v1558_v52 = vcombine.high %v75_v50, %v75_v50  ;;  %v1845_v53 = vld [vmem:[#allocation2 + $0x1b4] ss:$8 sps:$4 sm:$0xff]   ;;  %v1844_v54 = vld [vmem:[#allocation2 + $0xb0] ss:$8 sps:$4 sm:$0xff]   ;;  %v1555_v5 = vcombine.low %v74_v46, %v74_v46  ;;  %v1557_v7 = vcombine.low %v75_v50, %v75_v50 }
  0x36   :  { %715 = vmatpush1.bf16.msra.mxu0 %v1796_v18  ;;  %v1848_v55 = vld [vmem:[#allocation2 + $0xa4] ss:$8 sps:$4 sm:$0xff]   ;;  %v1847_v56 = vld [vmem:[#allocation2 + $0x1b0] ss:$8 sps:$4 sm:$0xff]   ;;  %v1850_v58 = vld [vmem:[#allocation2 + $0xa0] ss:$8 sps:$4 sm:$0xff]  }
  0x37   :  { %716 = vmatprep.subr.bf16.mxu0 %v1800_v19  ;;  %756 = vmatpush1.bf16.msra.mxu1 %v1799_v20  ;;  %v1851_v57 = vld [vmem:[#allocation2 + $0x1a4] ss:$8 sps:$4 sm:$0xff]   ;;  %v1854_v59 = vld [vmem:[#allocation2 + $0x94] ss:$8 sps:$4 sm:$0xff]   ;;  %v1853_v60 = vld [vmem:[#allocation2 + $0x1a0] ss:$8 sps:$4 sm:$0xff]  }
  0x38   :  { %757 = vmatprep.subr.bf16.mxu1 %v1803_v21  ;;  %738 = vmatprep.mubr.bf16.mxu0 %v1556_v48  ;;  %v1857_v61 = vld [vmem:[#allocation2 + $0x194] ss:$8 sps:$4 sm:$0xff]   ;;  %v1856_v62 = vld [vmem:[#allocation2 + $0x90] ss:$8 sps:$4 sm:$0xff]   ;;  %v1860_v63 = vld [vmem:[#allocation2 + $0x84] ss:$8 sps:$4 sm:$0xff]  }
  0x39   :  { %779 = vmatprep.mubr.bf16.mxu1 %v1558_v52  ;;  %v1859_v0 = vld [vmem:[#allocation2 + $0x190] ss:$8 sps:$4 sm:$0xff]   ;;  %v1863_v1 = vld [vmem:[#allocation2 + $0x184] ss:$8 sps:$4 sm:$0xff]   ;;  %v1862_v2 = vld [vmem:[#allocation2 + $0x80] ss:$8 sps:$4 sm:$0xff]  }
  0x3a   :  { %717 = vmatpush1.bf16.msra.mxu0 %v1802_v22  ;;  %v1870_v3 = vld [vmem:[#allocation2 + $0x274] ss:$8 sps:$4 sm:$0xff]   ;;  %v1867_v4 = vld [vmem:[#allocation2 + $0x180] ss:$8 sps:$4 sm:$0xff]   ;;  %v1868_v6 = vld [vmem:[#allocation2 + $0x270] ss:$8 sps:$4 sm:$0xff]  }
  0x3b   :  { %718 = vmatprep.subr.bf16.mxu0 %v1806_v23  ;;  %758 = vmatpush1.bf16.msra.mxu1 %v1805_v24  ;;  %v1875_v8 = vld [vmem:[#allocation2 + $0x264] ss:$8 sps:$4 sm:$0xff]   ;;  %v1915_v10 = vld [vmem:[#allocation2 + $0x300] ss:$8 sps:$4 sm:$0xff]   ;;  %v2174_v12 = vld [vmem:[%s2256_s0 + $0x10] sm:$0xff] }
  0x3c   :  { %759 = vmatprep.subr.bf16.mxu1 %v1809_v25  ;;  %v1917_v9 = vld [vmem:[#allocation2 + $0x304] ss:$8 sps:$4 sm:$0xff]   ;;  %v1873_v11 = vld [vmem:[#allocation2 + $0x260] ss:$8 sps:$4 sm:$0xff]   ;;  %v1878_v13 = vld [vmem:[#allocation2 + $0x254] ss:$8 sps:$4 sm:$0xff]   ;;  %v1560_v14 = vcombine.high %v2174_v12, %v2174_v12 }
  0x3d   :  { %v1876_v15 = vld [vmem:[#allocation2 + $0x250] ss:$8 sps:$4 sm:$0xff]   ;;  %v1881_v17 = vld [vmem:[#allocation2 + $0x244] ss:$8 sps:$4 sm:$0xff]   ;;  %v1879_v19 = vld [vmem:[#allocation2 + $0x240] ss:$8 sps:$4 sm:$0xff]  }
  0x3e   :  { %719 = vmatpush1.bf16.msra.mxu0 %v1808_v26  ;;  %v1921_v18 = vld [vmem:[%s2256_s0 + $0x18] ss:$0 sps:$4 sm:$0xff]   ;;  %v1884_v20 = vld [vmem:[#allocation2 + $0x234] ss:$8 sps:$4 sm:$0xff]   ;;  %v1887_v22 = vld [vmem:[#allocation2 + $0x224] ss:$8 sps:$4 sm:$0xff]  }
  0x3f   :  { %720 = vmatprep.subr.bf16.mxu0 %v1812_v27  ;;  %760 = vmatpush1.bf16.msra.mxu1 %v1811_v28  ;;  %v1882_v21 = vld [vmem:[#allocation2 + $0x230] ss:$8 sps:$4 sm:$0xff]   ;;  %v1885_v23 = vld [vmem:[#allocation2 + $0x220] ss:$8 sps:$4 sm:$0xff]   ;;  %v1890_v24 = vld [vmem:[#allocation2 + $0x214] ss:$8 sps:$4 sm:$0xff]  }
  0x40   :  { %761 = vmatprep.subr.bf16.mxu1 %v1815_v29  ;;  %v1888_v25 = vld [vmem:[#allocation2 + $0x210] ss:$8 sps:$4 sm:$0xff]   ;;  %v1893_v26 = vld [vmem:[#allocation2 + $0x204] ss:$8 sps:$4 sm:$0xff]   ;;  %v1891_v27 = vld [vmem:[#allocation2 + $0x200] ss:$8 sps:$4 sm:$0xff]  }
  0x41   :  { %v1896_v28 = vld [vmem:[#allocation2 + $0x2f4] ss:$8 sps:$4 sm:$0xff]   ;;  %v1894_v29 = vld [vmem:[#allocation2 + $0x2f0] ss:$8 sps:$4 sm:$0xff]   ;;  %v1926_v46 = vld [vmem:[#allocation4 + $0x74] ss:$8 sps:$4 sm:$0xff]  }
  0x42   :  { %721 = vmatpush1.bf16.msra.mxu0 %v1814_v30  ;;  %v1899_v30 = vld [vmem:[#allocation2 + $0x2e4] ss:$8 sps:$4 sm:$0xff]   ;;  %v1927_v48 = vld [vmem:[#allocation4 + $0x60] ss:$8 sps:$4 sm:$0xff]   ;;  %v1930_v50 = vld [vmem:[#allocation4 + $0x50] ss:$8 sps:$4 sm:$0xff]  }
  0x43   :  { %722 = vmatprep.subr.bf16.mxu0 %v1818_v31  ;;  %762 = vmatpush1.bf16.msra.mxu1 %v1817_v32  ;;  %v1897_v31 = vld [vmem:[#allocation2 + $0x2e0] ss:$8 sps:$4 sm:$0xff]   ;;  %v1902_v32 = vld [vmem:[#allocation2 + $0x2d4] ss:$8 sps:$4 sm:$0xff]   ;;  %v1933_v52 = vld [vmem:[#allocation4 + $0x40] ss:$8 sps:$4 sm:$0xff]  }
  0x44   :  { %763 = vmatprep.subr.bf16.mxu1 %v1821_v33  ;;  %v1900_v33 = vld [vmem:[#allocation2 + $0x2d0] ss:$8 sps:$4 sm:$0xff]  }
  0x46   :  { %723 = vmatpush2.bf16.msra.mxu0 %v1820_v34  ;;  %v1905_v34 = vld [vmem:[#allocation2 + $0x2c4] ss:$8 sps:$4 sm:$0xff]  }
  0x47   :  { %724 = vmatprep.subr.bf16.mxu0 %v1824_v35  ;;  %764 = vmatpush2.bf16.msra.mxu1 %v1823_v36  ;;  %v1903_v35 = vld [vmem:[#allocation2 + $0x2c0] ss:$8 sps:$4 sm:$0xff]   ;;  %v1908_v36 = vld [vmem:[#allocation2 + $0x2b4] ss:$8 sps:$4 sm:$0xff]  }
  0x48   :  { %765 = vmatprep.subr.bf16.mxu1 %v1827_v37  ;;  %v1906_v37 = vld [vmem:[#allocation2 + $0x2b0] ss:$8 sps:$4 sm:$0xff]  }
  0x4a   :  { %725 = vmatpush2.bf16.msra.mxu0 %v1826_v38  ;;  %v1911_v38 = vld [vmem:[#allocation2 + $0x2a4] ss:$8 sps:$4 sm:$0xff]  }
  0x4b   :  { %726 = vmatprep.subr.bf16.mxu0 %v1830_v39  ;;  %766 = vmatpush2.bf16.msra.mxu1 %v1829_v40  ;;  %v1909_v39 = vld [vmem:[#allocation2 + $0x2a0] ss:$8 sps:$4 sm:$0xff]   ;;  %v1914_v40 = vld [vmem:[#allocation2 + $0x294] ss:$8 sps:$4 sm:$0xff]  }
  0x4c   :  { %767 = vmatprep.subr.bf16.mxu1 %v1833_v41  ;;  %v1912_v41 = vld [vmem:[#allocation2 + $0x290] ss:$8 sps:$4 sm:$0xff]  }
  0x4e   :  { %727 = vmatpush2.bf16.msra.mxu0 %v1832_v42  ;;  %v1920_v42 = vld [vmem:[#allocation2 + $0x284] ss:$8 sps:$4 sm:$0xff]  }
  0x4f   :  { %728 = vmatprep.subr.bf16.mxu0 %v1836_v43  ;;  %768 = vmatpush2.bf16.msra.mxu1 %v1835_v44  ;;  %v1918_v43 = vld [vmem:[#allocation2 + $0x280] ss:$8 sps:$4 sm:$0xff]   ;;  %v1559_v44 = vcombine.low %v2174_v12, %v2174_v12  ;;  %v1969_v12 = vld [vmem:[#allocation4 + $0x80] ss:$8 sps:$4 sm:$0xff]  }
  0x50   :  { %769 = vmatprep.subr.bf16.mxu1 %v1839_v45  ;;  %v1924_v45 = vld [vmem:[#allocation4 + $0x70] ss:$8 sps:$4 sm:$0xff]  }
  0x52   :  { %729 = vmatpush2.bf16.msra.mxu0 %v1838_v47  ;;  %v1929_v47 = vld [vmem:[#allocation4 + $0x64] ss:$8 sps:$4 sm:$0xff]  }
  0x53   :  { %730 = vmatprep.subr.bf16.mxu0 %v1842_v49  ;;  %770 = vmatpush2.bf16.msra.mxu1 %v1841_v51  ;;  %v1932_v49 = vld [vmem:[#allocation4 + $0x54] ss:$8 sps:$4 sm:$0xff]   ;;  %v1935_v51 = vld [vmem:[#allocation4 + $0x44] ss:$8 sps:$4 sm:$0xff]  }
  0x54   :  { %771 = vmatprep.subr.bf16.mxu1 %v1845_v53  ;;  %v1938_v53 = vld [vmem:[#allocation4 + $0x34] ss:$8 sps:$4 sm:$0xff]  }
  0x56   :  { %731 = vmatpush2.bf16.msra.mxu0 %v1844_v54  ;;  %v1936_v54 = vld [vmem:[#allocation4 + $0x30] ss:$8 sps:$4 sm:$0xff]  }
  0x57   :  { %732 = vmatprep.subr.bf16.mxu0 %v1848_v55  ;;  %772 = vmatpush2.bf16.msra.mxu1 %v1847_v56  ;;  %v1941_v55 = vld [vmem:[#allocation4 + $0x24] ss:$8 sps:$4 sm:$0xff]   ;;  %v1939_v56 = vld [vmem:[#allocation4 + $0x20] ss:$8 sps:$4 sm:$0xff]  }
  0x58   :  { %773 = vmatprep.subr.bf16.mxu1 %v1851_v57  ;;  %v1944_v57 = vld [vmem:[#allocation4 + $0x14] ss:$8 sps:$4 sm:$0xff]  }
  0x5a   :  { %733 = vmatpush2.bf16.msra.mxu0 %v1850_v58  ;;  %v1942_v58 = vld [vmem:[#allocation4 + $0x10] ss:$8 sps:$4 sm:$0xff]  }
  0x5b   :  { %734 = vmatprep.subr.bf16.mxu0 %v1854_v59  ;;  %774 = vmatpush2.bf16.msra.mxu1 %v1853_v60  ;;  %v1947_v59 = vld [vmem:[#allocation4 + $0x4] ss:$8 sps:$4 sm:$0xff]   ;;  %v1945_v60 = vld [vmem:[#allocation4] ss:$8 sps:$4 sm:$0xff]  }
  0x5c   :  { %775 = vmatprep.subr.bf16.mxu1 %v1857_v61  ;;  %v1950_v61 = vld [vmem:[#allocation4 + $0xf4] ss:$8 sps:$4 sm:$0xff]  }
  0x5e   :  { %735 = vmatpush2.bf16.msra.mxu0 %v1856_v62  ;;  %v1948_v62 = vld [vmem:[#allocation4 + $0xf0] ss:$8 sps:$4 sm:$0xff]  }
  0x5f   :  { %736 = vmatprep.subr.bf16.mxu0 %v1860_v63  ;;  %776 = vmatpush2.bf16.msra.mxu1 %v1859_v0  ;;  %v1953_v63 = vld [vmem:[#allocation4 + $0xe4] ss:$8 sps:$4 sm:$0xff]   ;;  %v1951_v0 = vld [vmem:[#allocation4 + $0xe0] ss:$8 sps:$4 sm:$0xff]  }
  0x60   :  { %777 = vmatprep.subr.bf16.mxu1 %v1863_v1  ;;  %v1956_v1 = vld [vmem:[#allocation4 + $0xd4] ss:$8 sps:$4 sm:$0xff]  }
  0x62   :  { %737 = vmatpush2.bf16.msra.mxu0 %v1862_v2  ;;  %v1954_v2 = vld [vmem:[#allocation4 + $0xd0] ss:$8 sps:$4 sm:$0xff]  }
  0x63   :  { %788 = vmatprep.subr.bf16.mxu0 %v1870_v3  ;;  %778 = vmatpush2.bf16.msra.mxu1 %v1867_v4  ;;  %v1959_v3 = vld [vmem:[#allocation4 + $0xc4] ss:$8 sps:$4 sm:$0xff]   ;;  %v1957_v4 = vld [vmem:[#allocation4 + $0xc0] ss:$8 sps:$4 sm:$0xff]  }
  0x64   :  { %843 = vmatprep.subr.bf16.mxu1 %v1917_v9  ;;  %v1968_v9 = vld [vmem:[#allocation4 + $0x94] ss:$8 sps:$4 sm:$0xff]  }
  0x65   :  { %739 = vmatmul.mubr.bf16.vlgmr.msra.gmra.mxu0 %v1555_v5  ;;  %v1962_v5 = vld [vmem:[#allocation4 + $0xb4] ss:$8 sps:$4 sm:$0xff]  }
  0x66   :  { %789 = vmatpush1.bf16.msra.mxu0 %v1868_v6  ;;  %780 = vmatmul.mubr.bf16.vlgmr.msra.gmra.mxu1 %v1557_v7  ;;  %v1960_v6 = vld [vmem:[#allocation4 + $0xb0] ss:$8 sps:$4 sm:$0xff]   ;;  %v1965_v7 = vld [vmem:[#allocation4 + $0xa4] ss:$8 sps:$4 sm:$0xff]  }
  0x67   :  { %790 = vmatprep.subr.bf16.mxu0 %v1875_v8  ;;  %844 = vmatpush1.bf16.msra.mxu1 %v1915_v10  ;;  %v1963_v8 = vld [vmem:[#allocation4 + $0xa0] ss:$8 sps:$4 sm:$0xff]   ;;  %v1966_v10 = vld [vmem:[#allocation4 + $0x90] ss:$8 sps:$4 sm:$0xff]  }
  0x68   :  { %861 = vmatprep.mubr.bf16.mxu1 %v2105_v16  ;;  %820 = vmatprep.mubr.bf16.mxu0 %v1560_v14  ;;  %v1974_v14 = vld [vmem:[#allocation6 + $0x74] ss:$8 sps:$4 sm:$0xff]   ;;  %v1975_v16 = vld [vmem:[#allocation6 + $0x60] ss:$8 sps:$4 sm:$0xff]  }
  0x69   :  { %1078 = vmatprep.subr.bf16.mxu1 %v1926_v46 }
  0x6a   :  { %791 = vmatpush1.bf16.msra.mxu0 %v1873_v11  ;;  %v1971_v11 = vld [vmem:[#allocation4 + $0x84] ss:$8 sps:$4 sm:$0xff]  }
  0x6b   :  { %792 = vmatprep.subr.bf16.mxu0 %v1878_v13  ;;  %v1972_v13 = vld [vmem:[#allocation6 + $0x70] ss:$8 sps:$4 sm:$0xff]  }
  0x6e   :  { %793 = vmatpush1.bf16.msra.mxu0 %v1876_v15  ;;  %1660 = vmatmul.mubr.msk.bf16.vlgmr.msra.gmra.mxu1 %vm702_vm0, %v1921_v18  ;;  %v1977_v15 = vld [vmem:[#allocation6 + $0x64] ss:$8 sps:$4 sm:$0xff]   ;;  %v1978_v18 = vld [vmem:[#allocation6 + $0x50] ss:$8 sps:$4 sm:$0xff]  }
  0x6f   :  { %794 = vmatprep.subr.bf16.mxu0 %v1881_v17  ;;  %1079 = vmatpush1.bf16.msra.mxu1 %v1924_v45  ;;  %v1980_v17 = vld [vmem:[#allocation6 + $0x54] ss:$8 sps:$4 sm:$0xff]  }
  0x70   :  { %1080 = vmatprep.subr.bf16.mxu1 %v1929_v47 }
  0x72   :  { %795 = vmatpush1.bf16.msra.mxu0 %v1879_v19  ;;  %v1983_v19 = vld [vmem:[#allocation6 + $0x44] ss:$8 sps:$4 sm:$0xff]  }
  0x73   :  { %796 = vmatprep.subr.bf16.mxu0 %v1884_v20  ;;  %1081 = vmatpush1.bf16.msra.mxu1 %v1927_v48  ;;  %v1981_v20 = vld [vmem:[#allocation6 + $0x40] ss:$8 sps:$4 sm:$0xff]  }
  0x74   :  { %1082 = vmatprep.subr.bf16.mxu1 %v1932_v49 }
  0x76   :  { %797 = vmatpush1.bf16.msra.mxu0 %v1882_v21  ;;  %v1986_v21 = vld [vmem:[#allocation6 + $0x34] ss:$8 sps:$4 sm:$0xff]  }
  0x77   :  { %798 = vmatprep.subr.bf16.mxu0 %v1887_v22  ;;  %1083 = vmatpush1.bf16.msra.mxu1 %v1930_v50  ;;  %v1984_v22 = vld [vmem:[#allocation6 + $0x30] ss:$8 sps:$4 sm:$0xff]  }
  0x78   :  { %1084 = vmatprep.subr.bf16.mxu1 %v1935_v51 }
  0x7a   :  { %799 = vmatpush1.bf16.msra.mxu0 %v1885_v23  ;;  %v1989_v23 = vld [vmem:[#allocation6 + $0x24] ss:$8 sps:$4 sm:$0xff]  }
  0x7b   :  { %800 = vmatprep.subr.bf16.mxu0 %v1890_v24  ;;  %1085 = vmatpush1.bf16.msra.mxu1 %v1933_v52  ;;  %v1987_v24 = vld [vmem:[#allocation6 + $0x20] ss:$8 sps:$4 sm:$0xff]  }
  0x7c   :  { %1086 = vmatprep.subr.bf16.mxu1 %v1938_v53  ;;  %v178_v53 = vlaneseq }
  0x7e   :  { %801 = vmatpush1.bf16.msra.mxu0 %v1888_v25  ;;  %v1992_v25 = vld [vmem:[#allocation6 + $0x14] ss:$8 sps:$4 sm:$0xff]  }
  0x7f   :  { %802 = vmatprep.subr.bf16.mxu0 %v1893_v26  ;;  %1087 = vmatpush1.bf16.msra.mxu1 %v1936_v54  ;;  %v1990_v26 = vld [vmem:[#allocation6 + $0x10] ss:$8 sps:$4 sm:$0xff]   ;;  %v179_v54 = vshrl.u32 %v178_v53, 7 }
  0x80   :  { %1088 = vmatprep.subr.bf16.mxu1 %v1941_v55 }
  0x81   :  { %v2183_v55 = vsub.s32 0, %v179_v54 }
  0x82   :  { %803 = vmatpush1.bf16.msra.mxu0 %v1891_v27  ;;  %v1995_v27 = vld [vmem:[#allocation6 + $0x4] ss:$8 sps:$4 sm:$0xff]  }
  0x83   :  { %804 = vmatprep.subr.bf16.mxu0 %v1896_v28  ;;  %1089 = vmatpush1.bf16.msra.mxu1 %v1939_v56  ;;  %v1993_v28 = vld [vmem:[#allocation6] ss:$8 sps:$4 sm:$0xff]   ;;  %v176_v56 = vld [vmem:[%s2258_s2] sm:$0x3] }
  0x84   :  { %1090 = vmatprep.subr.bf16.mxu1 %v1944_v57  ;;  %v2188_v57 = vsub.s32 1, %v179_v54 }
  0x86   :  { %805 = vmatpush2.bf16.msra.mxu0 %v1894_v29  ;;  %v1998_v29 = vld [vmem:[#allocation6 + $0xf4] ss:$8 sps:$4 sm:$0xff]  }
  0x87   :  { %806 = vmatprep.subr.bf16.mxu0 %v1899_v30  ;;  %1091 = vmatpush1.bf16.msra.mxu1 %v1942_v58  ;;  %v1996_v30 = vld [vmem:[#allocation6 + $0xf0] ss:$8 sps:$4 sm:$0xff]   ;;  %v181_v58 = vrot.slane %v176_v56, %v2183_v55 }
  0x88   :  { %1092 = vmatprep.subr.bf16.mxu1 %v1947_v59  ;;  %v185_v59 = vrot.slane %v176_v56, %v2188_v57 }
  0x8a   :  { %807 = vmatpush2.bf16.msra.mxu0 %v1897_v31  ;;  %v2001_v31 = vld [vmem:[#allocation6 + $0xe4] ss:$8 sps:$4 sm:$0xff]  }
  0x8b   :  { %808 = vmatprep.subr.bf16.mxu0 %v1902_v32  ;;  %1093 = vmatpush1.bf16.msra.mxu1 %v1945_v60  ;;  %v1999_v32 = vld [vmem:[#allocation6 + $0xe0] ss:$8 sps:$4 sm:$0xff]  }
  0x8c   :  { %1094 = vmatprep.subr.bf16.mxu1 %v1950_v61 }
  0x8e   :  { %809 = vmatpush2.bf16.msra.mxu0 %v1900_v33  ;;  %v2004_v33 = vld [vmem:[#allocation6 + $0xd4] ss:$8 sps:$4 sm:$0xff]  }
  0x8f   :  { %810 = vmatprep.subr.bf16.mxu0 %v1905_v34  ;;  %1095 = vmatpush2.bf16.msra.mxu1 %v1948_v62  ;;  %v2002_v34 = vld [vmem:[#allocation6 + $0xd0] ss:$8 sps:$4 sm:$0xff]  }
  0x90   :  { %1096 = vmatprep.subr.bf16.mxu1 %v1953_v63 }
  0x92   :  { %811 = vmatpush2.bf16.msra.mxu0 %v1903_v35  ;;  %v2007_v35 = vld [vmem:[#allocation6 + $0xc4] ss:$8 sps:$4 sm:$0xff]  }
  0x93   :  { %812 = vmatprep.subr.bf16.mxu0 %v1908_v36  ;;  %1097 = vmatpush2.bf16.msra.mxu1 %v1951_v0  ;;  %v2005_v36 = vld [vmem:[#allocation6 + $0xc0] ss:$8 sps:$4 sm:$0xff]  }
  0x94   :  { %1098 = vmatprep.subr.bf16.mxu1 %v1956_v1 }
  0x96   :  { %813 = vmatpush2.bf16.msra.mxu0 %v1906_v37  ;;  %v2010_v37 = vld [vmem:[#allocation6 + $0xb4] ss:$8 sps:$4 sm:$0xff]  }
  0x97   :  { %814 = vmatprep.subr.bf16.mxu0 %v1911_v38  ;;  %1099 = vmatpush2.bf16.msra.mxu1 %v1954_v2  ;;  %v2008_v38 = vld [vmem:[#allocation6 + $0xb0] ss:$8 sps:$4 sm:$0xff]  }
  0x98   :  { %1100 = vmatprep.subr.bf16.mxu1 %v1959_v3 }
  0x9a   :  { %815 = vmatpush2.bf16.msra.mxu0 %v1909_v39  ;;  %v2013_v39 = vld [vmem:[#allocation6 + $0xa4] ss:$8 sps:$4 sm:$0xff]  }
  0x9b   :  { %816 = vmatprep.subr.bf16.mxu0 %v1914_v40  ;;  %1101 = vmatpush2.bf16.msra.mxu1 %v1957_v4  ;;  %v2011_v40 = vld [vmem:[#allocation6 + $0xa0] ss:$8 sps:$4 sm:$0xff]  }
  0x9c   :  { %1102 = vmatprep.subr.bf16.mxu1 %v1962_v5 }
  0x9e   :  { %817 = vmatpush2.bf16.msra.mxu0 %v1912_v41 }
  0x9f   :  { %818 = vmatprep.subr.bf16.mxu0 %v1920_v42  ;;  %1103 = vmatpush2.bf16.msra.mxu1 %v1960_v6 }
  0xa0   :  { %1104 = vmatprep.subr.bf16.mxu1 %v1965_v7 }
  0xa2   :  { %819 = vmatpush2.bf16.msra.mxu0 %v1918_v43 }
  0xa3   :  { %1105 = vmatpush2.bf16.msra.mxu1 %v1963_v8  ;;  %1327 = vmatprep.subr.bf16.mxu0 %v1974_v14  ;;  %v2019_v14 = vld [vmem:[#allocation6 + $0x84] ss:$8 sps:$4 sm:$0xff]  }
  0xa4   :  { %1106 = vmatprep.subr.bf16.mxu1 %v1968_v9 }
  0xa5   :  { %821 = vmatmul.mubr.bf16.vlgmr.msra.gmra.mxu0 %v1559_v44 }
  0xa6   :  { %1328 = vmatpush1.bf16.msra.mxu0 %v1972_v13  ;;  %v2014_v13 = vld [vmem:[#allocation6 + $0x90] ss:$8 sps:$4 sm:$0xff]  }
  0xa7   :  { %1107 = vmatpush2.bf16.msra.mxu1 %v1966_v10  ;;  %1329 = vmatprep.subr.bf16.mxu0 %v1977_v15  ;;  %v2017_v15 = vld [vmem:[#allocation6 + $0x80] ss:$8 sps:$4 sm:$0xff]  }
  0xa8   :  { %1108 = vmatprep.subr.bf16.mxu1 %v1971_v11 }
  0xaa   :  { %1330 = vmatpush1.bf16.msra.mxu0 %v1975_v16  ;;  %v2020_v16 = vld [vmem:[%s2263_s7 + $0x78] sm:$0xff]  }
  0xab   :  { %1109 = vmatpush2.bf16.msra.mxu1 %v1969_v12  ;;  %1331 = vmatprep.subr.bf16.mxu0 %v1980_v17  ;;  %v2016_v12 = vld [vmem:[#allocation6 + $0x94] ss:$8 sps:$4 sm:$0xff]   ;;  %v2021_v17 = vld [vmem:[%s2263_s7 + $0x38] sm:$0xff]  }
  0xac   :  { %1742 = vmatprep.subr.bf16.mxu1 %v2020_v16 }
  0xae   :  { %1332 = vmatpush1.bf16.msra.mxu0 %v1978_v18  ;;  %v2022_v18 = vld [vmem:[%s2263_s7 + $0x70] sm:$0xff]  }
  0xaf   :  { %1333 = vmatprep.subr.bf16.mxu0 %v1983_v19  ;;  %v2023_v19 = vld [vmem:[%s2263_s7 + $0x30] sm:$0xff]  }
  0xb2   :  { %1334 = vmatpush1.bf16.msra.mxu0 %v1981_v20  ;;  %v2024_v20 = vld [vmem:[%s2263_s7 + $0x68] sm:$0xff]  }
  0xb3   :  { %1335 = vmatprep.subr.bf16.mxu0 %v1986_v21  ;;  %v2025_v21 = vld [vmem:[%s2263_s7 + $0x28] sm:$0xff]  }
  0xb6   :  { %1336 = vmatpush1.bf16.msra.mxu0 %v1984_v22  ;;  %v2026_v22 = vld [vmem:[%s2263_s7 + $0x60] sm:$0xff]  }
  0xb7   :  { %1337 = vmatprep.subr.bf16.mxu0 %v1989_v23  ;;  %v2027_v23 = vld [vmem:[%s2263_s7 + $0x20] sm:$0xff]  }
  0xba   :  { %1338 = vmatpush1.bf16.msra.mxu0 %v1987_v24  ;;  %v2028_v24 = vld [vmem:[%s2263_s7 + $0x58] sm:$0xff]  }
  0xbb   :  { %1339 = vmatprep.subr.bf16.mxu0 %v1992_v25  ;;  %v2029_v25 = vld [vmem:[%s2263_s7 + $0x18] sm:$0xff]  }
  0xbe   :  { %1340 = vmatpush1.bf16.msra.mxu0 %v1990_v26  ;;  %v2030_v26 = vld [vmem:[%s2263_s7 + $0x50] sm:$0xff]  }
  0xbf   :  { %1341 = vmatprep.subr.bf16.mxu0 %v1995_v27  ;;  %v2031_v27 = vld [vmem:[%s2263_s7 + $0x10] sm:$0xff]  }
  0xc2   :  { %1342 = vmatpush1.bf16.msra.mxu0 %v1993_v28  ;;  %v906_v28 = vld [vmem:[%s2260_s4] sm:$0x3] }
  0xc3   :  { %1343 = vmatprep.subr.bf16.mxu0 %v1998_v29  ;;  %v911_v29 = vrot.slane %v906_v28, %v2183_v55 }
  0xc6   :  { %1344 = vmatpush2.bf16.msra.mxu0 %v1996_v30  ;;  %v915_v30 = vrot.slane %v906_v28, %v2188_v57 }
  0xc7   :  { %1345 = vmatprep.subr.bf16.mxu0 %v2001_v31 }
  0xca   :  { %1346 = vmatpush2.bf16.msra.mxu0 %v1999_v32 }
  0xcb   :  { %1347 = vmatprep.subr.bf16.mxu0 %v2004_v33 }
  0xce   :  { %1348 = vmatpush2.bf16.msra.mxu0 %v2002_v34 }
  0xcf   :  { %1349 = vmatprep.subr.bf16.mxu0 %v2007_v35 }
  0xd2   :  { %1350 = vmatpush2.bf16.msra.mxu0 %v2005_v36 }
  0xd3   :  { %1351 = vmatprep.subr.bf16.mxu0 %v2010_v37 }
  0xd6   :  { %1352 = vmatpush2.bf16.msra.mxu0 %v2008_v38 }
  0xd7   :  { %1353 = vmatprep.subr.bf16.mxu0 %v2013_v39 }
  0xda   :  { %1354 = vmatpush2.bf16.msra.mxu0 %v2011_v40 }
  0xdb   :  { %1355 = vmatprep.subr.bf16.mxu0 %v2016_v12 }
  0xde   :  { %1356 = vmatpush2.bf16.msra.mxu0 %v2014_v13 }
  0xdf   :  { %1357 = vmatprep.subr.bf16.mxu0 %v2019_v14 }
  0xe2   :  { %1358 = vmatpush2.bf16.msra.mxu0 %v2017_v15 }
 0x125   :  { %v740_v41 = vpop.f32.mrf.mxu0 }
 0x126   :  { %v781_v43 = vpop.f32.mrf.mxu1  ;;  %v741_v60 = vadd.f32 %v740_v41, %v181_v58  ;;  %v2032_v41 = vld [vmem:[%s2263_s7 + $0x48] sm:$0xff]  }
 0x127   :  { %v742_v42 = vpop.f32.mrf.mxu0 }
 0x128   :  { %v783_v45 = vpop.f32.mrf.mxu1  ;;  %v743_v61 = vadd.f32 %v742_v42, %v185_v59  ;;  %v782_v62 = vadd.f32 %v781_v43, %v741_v60  ;;  %v2033_v42 = vld [vmem:[%s2263_s7 + $0x8] sm:$0xff]   ;;  %v2034_v43 = vld [vmem:[%s2263_s7 + $0x40] sm:$0xff]  }
 0x129   :  { %v744_v44 = vpop.f32.mrf.mxu0 }
 0x12a   :  { %v785_v47 = vpop.f32.mrf.mxu1  ;;  %v784_v0 = vadd.f32 %v783_v45, %v743_v61  ;;  %v2035_v44 = vld [vmem:[%s2263_s7] sm:$0xff]  }
 0x12b   :  { %v745_v46 = vpop.f32.mrf.mxu0  ;;  %v1155_v45 = vld [vmem:[%s2262_s6] sm:$0x3] }
 0x12c   :  { %v786_v48 = vpop.f32.mrf.mxu1  ;;  %v1160_v46 = vrot.slane %v1155_v45, %v2183_v55  ;;  %v1164_v47 = vrot.slane %v1155_v45, %v2188_v57  ;;  %v1725_v61 = vld [vmem:[%s2264_s8] ss:$0 sm:$0xff] }
 0x12e   :  { %v863_v49 = vpop.f32.mrf.mxu1 }
 0x130   :  { %v865_v50 = vpop.f32.mrf.mxu1 }
 0x132   :  { %v867_v51 = vpop.f32.mrf.mxu1 }
 0x134   :  { %v868_v52 = vpop.f32.mrf.mxu1 }
 0x165   :  { %v822_v63 = vpop.f32.mrf.mxu0 }
 0x166   :  { %v823_v1 = vadd.f32 %v822_v63, %v782_v62 }
 0x167   :  { %v824_v2 = vpop.f32.mrf.mxu0 }
 0x168   :  { %v864_v3 = vadd.f32 %v863_v49, %v823_v1  ;;  %v825_v4 = vadd.f32 %v824_v2, %v784_v0 }
 0x169   :  { %v826_v5 = vpop.f32.mrf.mxu0 }
 0x16a   :  { %v866_v6 = vadd.f32 %v865_v50, %v825_v4  ;;  %v870_v7 = vmax.f32 %v864_v3, 0.0 }
 0x16b   :  { %v827_v8 = vpop.f32.mrf.mxu0 }
 0x16c   :  { %v871_v9 = vmax.f32 %v866_v6, 0.0  ;;  %v872_v11 = vpack.c.bf16 %v870_v7, %v870_v7 }
 0x16e   :  { %v873_v10 = vpack.c.bf16 %v871_v9, %v871_v9 }
 0x170   :  { %1110 = vmatprep.mubr.bf16.mxu1 %v873_v10 }
 0x171   :  { %1111 = vmatmul.mubr.bf16.vlgmr.msra.gmra.mxu1 %v872_v11 }
 0x172   :  { %1743 = vmatpush3.bf16.msra.mxu1 %v2021_v17 }
 0x173   :  { %1744 = vmatprep.subr.bf16.mxu1 %v2022_v18 }
 0x176   :  { %1745 = vmatpush3.bf16.msra.mxu1 %v2023_v19 }
 0x177   :  { %1746 = vmatprep.subr.bf16.mxu1 %v2024_v20 }
 0x17a   :  { %1747 = vmatpush3.bf16.msra.mxu1 %v2025_v21 }
 0x17b   :  { %1748 = vmatprep.subr.bf16.mxu1 %v2026_v22 }
 0x17e   :  { %1749 = vmatpush3.bf16.msra.mxu1 %v2027_v23 }
 0x17f   :  { %1750 = vmatprep.subr.bf16.mxu1 %v2028_v24 }
 0x182   :  { %1751 = vmatpush3.bf16.msra.mxu1 %v2029_v25 }
 0x183   :  { %1752 = vmatprep.subr.bf16.mxu1 %v2030_v26 }
 0x186   :  { %1753 = vmatpush3.bf16.msra.mxu1 %v2031_v27 }
 0x187   :  { %1754 = vmatprep.subr.bf16.mxu1 %v2032_v41 }
 0x18a   :  { %1755 = vmatpush3.bf16.msra.mxu1 %v2033_v42 }
 0x18b   :  { %1756 = vmatprep.subr.bf16.mxu1 %v2034_v43 }
 0x18e   :  { %1757 = vmatpush3.bf16.msra.mxu1 %v2035_v44 }
 0x231   :  { %v1112_v31 = vpop.f32.mrf.mxu1 }
 0x232   :  { %v1113_v32 = vadd.f32 %v1112_v31, %v911_v29 }
 0x233   :  { %v1114_v33 = vpop.f32.mrf.mxu1 }
 0x234   :  { %v1115_v34 = vadd.f32 %v1114_v33, %v915_v30  ;;  %v1119_v35 = vmax.f32 %v1113_v32, 0.0 }
 0x235   :  { %v1116_v36 = vpop.f32.mrf.mxu1 }
 0x236   :  { %v1120_v37 = vmax.f32 %v1115_v34, 0.0  ;;  %v1121_v40 = vpack.c.bf16 %v1119_v35, %v1119_v35 }
 0x237   :  { %v1117_v38 = vpop.f32.mrf.mxu1 }
 0x238   :  { %v1122_v39 = vpack.c.bf16 %v1120_v37, %v1120_v37 }
 0x23a   :  { %1359 = vmatprep.mubr.bf16.mxu0 %v1122_v39 }
 0x23b   :  { %1360 = vmatmul.mubr.bf16.vlgmr.msra.gmra.mxu0 %v1121_v40 }
 0x2fb   :  { %v1361_v48 = vpop.f32.mrf.mxu0 }
 0x2fc   :  { %v1362_v49 = vadd.f32 %v1361_v48, %v1160_v46 }
 0x2fd   :  { %v1363_v50 = vpop.f32.mrf.mxu0 }
 0x2fe   :  { %v1364_v51 = vadd.f32 %v1363_v50, %v1164_v47  ;;  %v1368_v52 = vmax.f32 %v1362_v49, 0.0 }
 0x2ff   :  { %v1365_v53 = vpop.f32.mrf.mxu0 }
 0x300   :  { %v1369_v54 = vmax.f32 %v1364_v51, 0.0  ;;  %v1370_v59 = vpack.c.bf16 %v1368_v52, %v1368_v52 }
 0x301   :  { %v1366_v56 = vpop.f32.mrf.mxu0 }
 0x302   :  { %v1371_v58 = vpack.c.bf16 %v1369_v54, %v1369_v54 }
 0x304   :  { %1539 = vmatprep.mubr.bf16.mxu1 %v1371_v58 }
 0x305   :  { %1540 = vmatmul.mubr.bf16.vlgmr.msra.gmra.mxu1 %v1370_v59 }
 0x3c5   :  { %v1758_v60 = vpop.f32.mrf.mxu1 }
 0x3c7   :  { %v1759_v55 = vpop.f32.mrf.mxu1 }
 0x3c8   :  { %v1760_v62 = vadd.f32 %v1759_v55, %v1758_v60 }
 0x3c9   :  { %v1761_v57 = vpop.f32.mrf.mxu1 }
 0x3ca   :  { %v1542_v63 = vadd.f32 %v1760_v62, %v1725_v61 }
 0x3cb   :  { %v1762_v0 = vpop.f32.mrf.mxu1 }
 0x3cc   :  { %v1547_v1 = vmax.f32 %v1542_v63, 0.0 }
 0x3ce   :  { %1548 = vst [vmem:[%s2265_s9] sm:$0xff] %v1547_v1 }
 0x3cf   :  { %1553 = vsyncpa [#allocation3], 1 }
 0x3d0   :  { %1554 = vsyncpa [#allocation5], 1 }

</bundles_post_ra>
